<compile_context>
chip_gen: v7x
topology: tpu7x:2x2x1
jax: 0.10.0
libtpu: 0.0.40
codegen_flags: <defaults>
</compile_context>

<pallas_src>
import jax
import jax.numpy as jnp
from jax.experimental import pallas as pl
from jax.experimental.pallas import tpu as pltpu


F_IN_PAD = 8    # input feature dim padded (only the first in_feats cols real)
OUT_PAD = 8     # layer-2 output columns padded (only column 0 is real)


def discriminator_kernel(a_ref, x_ref, w_rel1_ref, w_root1_ref, b1_ref,
                         w2_ref, b2_ref, o_ref):
    a = a_ref[0]                       # (N, N)        bf16 dense adjacency
    x = x_ref[0]                       # (N, F_IN_PAD) bf16 node features
    out_pad = b2_ref.shape[1]          # static

    # --- GraphConv layer 1 (reassociated): (A @ x) @ W_rel1 + x @ W_root1 ---
    ax = jnp.dot(a, x, preferred_element_type=jnp.float32)            # (N, F)
    agg1 = jnp.dot(ax.astype(jnp.bfloat16), w_rel1_ref[...],
                   preferred_element_type=jnp.float32)                # (N, H)
    root1 = jnp.dot(x, w_root1_ref[...],
                    preferred_element_type=jnp.float32)               # (N, H)
    h = jnp.maximum(agg1 + root1 + b1_ref[...], 0.0)                  # ReLU f32

    # --- GraphConv layer 2: A @ (h W_rel2) + h W_root2 + b2 (rel|root fused) ---
    h16 = h.astype(jnp.bfloat16)                                      # cast once
    p2 = jnp.dot(h16, w2_ref[...], preferred_element_type=jnp.float32)  # (N, 2*OUT)
    p2_rel = p2[:, :out_pad]
    p2_root = p2[:, out_pad:]
    agg2 = jnp.dot(a, p2_rel.astype(jnp.bfloat16),
                   preferred_element_type=jnp.float32)                # (N, OUT)
    # Pad columns 1..OUT_PAD-1 hold sigmoid(0)=0.5; the wrapper slices [:, :, :1].
    o_ref[0] = jax.nn.sigmoid(agg2 + p2_root + b2_ref[...])


def _vmem_limit_bytes():
    """Generation-aware VMEM limit with headroom below the physical ceiling."""
    try:
        cap = pltpu.get_tpu_info().vmem_capacity_bytes
    except Exception:
        cap = 128 * 1024 * 1024
    return min(100 * 1024 * 1024, int(cap * 0.8))


def build_adjacency(edge_index, num_nodes):
    """Dense A[dst, src] = edge multiplicity (exact in bf16 for counts <= 256).

    Build once per graph and cache across forward calls; the forward pass
    never rebuilds it.
    TODO(synk): scalar-prefetched CSR + in-kernel gather for large sparse graphs.
    """
    src, dst = edge_index[0], edge_index[1]
    a = jnp.zeros((num_nodes, num_nodes), jnp.float32).at[dst, src].add(1.0)
    return a.astype(jnp.bfloat16)


def pad_features(x, f_in_pad=F_IN_PAD):
    """(G, N, in_feats) f32 -> (G, N, f_in_pad) bf16 (zero-padded features)."""
    g, n, f_in = x.shape
    x_pad = jnp.zeros((g, n, f_in_pad), jnp.float32).at[:, :, :f_in].set(x)
    return x_pad.astype(jnp.bfloat16)


def discriminator_forward(a, x_pad, packed):
    """a: (G, N, N) bf16, x_pad: (G, N, F_IN_PAD) bf16. Returns (G, N, 1) f32."""
    num_graphs, n, _ = a.shape
    f_in_pad = x_pad.shape[-1]
    out_pad = packed["b2"].shape[1]

    def full(shape):
        return pl.BlockSpec(shape, lambda g, shape=shape: (0,) * len(shape))

    out = pl.pallas_call(
        discriminator_kernel,
        out_shape=jax.ShapeDtypeStruct((num_graphs, n, out_pad), jnp.float32),
        grid=(num_graphs,),
        in_specs=[
            pl.BlockSpec((1, n, n), lambda g: (g, 0, 0)),          # A, per graph
            pl.BlockSpec((1, n, f_in_pad), lambda g: (g, 0, 0)),   # x, per graph
            full(packed["w_rel1"].shape),
            full(packed["w_root1"].shape),
            full(packed["b1"].shape),
            full(packed["w2"].shape),
            full(packed["b2"].shape),
        ],
        # TODO(synk): for large G, pack 16 graphs' 8-lane outputs into one
        # 128-lane slab per grid step to make the output stores lane-dense.
        out_specs=pl.BlockSpec((1, n, out_pad), lambda g: (g, 0, 0)),
        compiler_params=pltpu.CompilerParams(
            dimension_semantics=("parallel",),   # graphs -> 2nd TC on v7x
            vmem_limit_bytes=_vmem_limit_bytes()),
    )(a, x_pad, packed["w_rel1"], packed["w_root1"], packed["b1"],
      packed["w2"], packed["b2"])

    return out[:, :, :1]


def init_params(key, in_feats, hidden_feats):
    """Raw f32 weights, stored (in, out) so x @ W == PyTorch x @ W^T."""
    k = jax.random.split(key, 6)
    s1 = 1.0 / jnp.sqrt(jnp.float32(in_feats))
    s2 = 1.0 / jnp.sqrt(jnp.float32(hidden_feats))
    return {
        "w_rel1": jax.random.uniform(k[0], (in_feats, hidden_feats), jnp.float32, -s1, s1),
        "w_root1": jax.random.uniform(k[1], (in_feats, hidden_feats), jnp.float32, -s1, s1),
        "b1": jax.random.uniform(k[2], (1, hidden_feats), jnp.float32, -s1, s1),
        "w_rel2": jax.random.uniform(k[3], (hidden_feats, 1), jnp.float32, -s2, s2),
        "w_root2": jax.random.uniform(k[4], (hidden_feats, 1), jnp.float32, -s2, s2),
        "b2": jax.random.uniform(k[5], (1, 1), jnp.float32, -s2, s2),
    }


def pack_params(params, f_in_pad=F_IN_PAD, out_pad=OUT_PAD):
    """Pad / fuse / bf16-cast weights into the kernel's MXU-friendly layout."""
    in_feats, hidden = params["w_rel1"].shape
    w_rel1 = jnp.zeros((f_in_pad, hidden), jnp.float32).at[:in_feats].set(params["w_rel1"])
    w_root1 = jnp.zeros((f_in_pad, hidden), jnp.float32).at[:in_feats].set(params["w_root1"])
    # Layer 2: [W_rel2 | W_root2], each padded to out_pad zero columns.
    w2 = (jnp.zeros((hidden, 2 * out_pad), jnp.float32)
          .at[:, :1].set(params["w_rel2"])
          .at[:, out_pad:out_pad + 1].set(params["w_root2"]))
    b2 = jnp.zeros((1, out_pad), jnp.float32).at[:, :1].set(params["b2"])
    return {
        "w_rel1": w_rel1.astype(jnp.bfloat16),
        "w_root1": w_root1.astype(jnp.bfloat16),
        "b1": params["b1"],                       # bias stays f32 (VPU add)
        "w2": w2.astype(jnp.bfloat16),
        "b2": b2,                                 # f32
    }


def reference_forward(x, edge_index, params):
    """Pure-f32 JAX reference with PyG GraphConv's original association."""
    n = x.shape[0]
    src, dst = edge_index[0], edge_index[1]
    a = jnp.zeros((n, n), jnp.float32).at[dst, src].add(1.0)
    h = (a @ x) @ params["w_rel1"] + params["b1"] + x @ params["w_root1"]
    h = jnp.maximum(h, 0.0)
    z = (a @ h) @ params["w_rel2"] + params["b2"] + h @ params["w_root2"]
    return jax.nn.sigmoid(z)


if __name__ == "__main__":
    G = 4               # graphs batched into one pallas_call (one per grid step)
    N = 16              # nodes per graph (small demo graphs)
    in_feats = 1        # as in the original script
    hidden_feats = 128  # as in the original script (lane-dense hidden)
    num_edges = 32

    key = jax.random.PRNGKey(0)
    k_x, k_e, k_p = jax.random.split(key, 3)

    x = jax.random.normal(k_x, (G, N, in_feats), jnp.float32)
    edge_keys = jax.random.split(k_e, G)
    edge_indices = [jax.random.randint(edge_keys[g], (2, num_edges), 0, N,
                                       dtype=jnp.int32) for g in range(G)]

    params = init_params(k_p, in_feats, hidden_feats)
    packed = pack_params(params)

    # Dense adjacencies built ONCE here (cacheable across forward calls).
    a = jnp.stack([build_adjacency(ei, N) for ei in edge_indices], axis=0)
    x_pad = pad_features(x)

    out = discriminator_forward(a, x_pad, packed)
    out = jax.block_until_ready(out)

    ref = jnp.stack([reference_forward(x[g], edge_indices[g], params)
                     for g in range(G)], axis=0)

    assert out.shape == (G, N, 1), out.shape
    # Loose tolerance: the kernel feeds bf16 operands to every matmul
    # (f32 accumulation); the reference is pure f32 with PyG's ordering.
    assert jnp.allclose(out, ref, atol=5e-2, rtol=0.0), "mismatch vs reference"

    print("KERNEL_OK")
</pallas_src>

<mosaic_0001>
module attributes {stable_mosaic.version = 11 : i64} {
  func.func @discriminator_kernel(%arg0: i32, %arg1: memref<1x16x16xbf16, #tpu.memory_space<vmem>>, %arg2: memref<1x16x8xbf16, #tpu.memory_space<vmem>>, %arg3: memref<8x128xbf16, #tpu.memory_space<vmem>>, %arg4: memref<8x128xbf16, #tpu.memory_space<vmem>>, %arg5: memref<1x128xf32, #tpu.memory_space<vmem>>, %arg6: memref<128x16xbf16, #tpu.memory_space<vmem>>, %arg7: memref<1x8xf32, #tpu.memory_space<vmem>>, %arg8: memref<1x16x8xf32, #tpu.memory_space<vmem>>) attributes {dimension_semantics = [#tpu.dimension_semantics<parallel>], iteration_bounds = array<i64: 4>, scalar_prefetch = 0 : i64, scratch_operands = 0 : i64, tpu.core_type = #tpu.core_type<tc>, window_params = [{transform_indices = @transform_0, window_bounds = array<i64: 1, 16, 16>}, {transform_indices = @transform_1, window_bounds = array<i64: 1, 16, 8>}, {pipeline_mode = #tpu.pipeline_mode<synchronous>, transform_indices = @transform_2, window_bounds = array<i64: 8, 128>}, {pipeline_mode = #tpu.pipeline_mode<synchronous>, transform_indices = @transform_3, window_bounds = array<i64: 8, 128>}, {pipeline_mode = #tpu.pipeline_mode<synchronous>, transform_indices = @transform_4, window_bounds = array<i64: 1, 128>}, {pipeline_mode = #tpu.pipeline_mode<synchronous>, transform_indices = @transform_5, window_bounds = array<i64: 128, 16>}, {pipeline_mode = #tpu.pipeline_mode<synchronous>, transform_indices = @transform_6, window_bounds = array<i64: 1, 8>}, {transform_indices = @transform_7, window_bounds = array<i64: 1, 16, 8>}]} {
    %c0 = arith.constant 0 : index
    %c0_0 = arith.constant 0 : index
    %c0_1 = arith.constant 0 : index
    %0 = vector.load %arg1[%c0, %c0_0, %c0_1] : memref<1x16x16xbf16, #tpu.memory_space<vmem>>, vector<1x16x16xbf16>
    %1 = vector.shape_cast %0 : vector<1x16x16xbf16> to vector<16x16xbf16>
    %c0_2 = arith.constant 0 : index
    %c0_3 = arith.constant 0 : index
    %c0_4 = arith.constant 0 : index
    %2 = vector.load %arg2[%c0_2, %c0_3, %c0_4] : memref<1x16x8xbf16, #tpu.memory_space<vmem>>, vector<1x16x8xbf16>
    %3 = vector.shape_cast %2 : vector<1x16x8xbf16> to vector<16x8xbf16>
    %cst = arith.constant dense<0.000000e+00> : vector<16x8xf32>
    %4 = tpu.matmul %1, %3, %cst {dimension_numbers = #tpu.dot_dimension_numbers<[1], [0], [0], [1], [0, 0, 1, 1], [], []>} : vector<16x16xbf16>, vector<16x8xbf16>, vector<16x8xf32> -> vector<16x8xf32>
    %5 = arith.truncf %4 : vector<16x8xf32> to vector<16x8xbf16>
    %c0_5 = arith.constant 0 : index
    %c0_6 = arith.constant 0 : index
    %6 = vector.load %arg3[%c0_5, %c0_6] : memref<8x128xbf16, #tpu.memory_space<vmem>>, vector<8x128xbf16>
    %cst_7 = arith.constant dense<0.000000e+00> : vector<16x128xf32>
    %7 = tpu.matmul %5, %6, %cst_7 {dimension_numbers = #tpu.dot_dimension_numbers<[1], [0], [0], [1], [0, 0, 1, 1], [], []>} : vector<16x8xbf16>, vector<8x128xbf16>, vector<16x128xf32> -> vector<16x128xf32>
    %c0_8 = arith.constant 0 : index
    %c0_9 = arith.constant 0 : index
    %8 = vector.load %arg4[%c0_8, %c0_9] : memref<8x128xbf16, #tpu.memory_space<vmem>>, vector<8x128xbf16>
    %cst_10 = arith.constant dense<0.000000e+00> : vector<16x128xf32>
    %9 = tpu.matmul %3, %8, %cst_10 {dimension_numbers = #tpu.dot_dimension_numbers<[1], [0], [0], [1], [0, 0, 1, 1], [], []>} : vector<16x8xbf16>, vector<8x128xbf16>, vector<16x128xf32> -> vector<16x128xf32>
    %10 = arith.addf %7, %9 : vector<16x128xf32>
    %c0_11 = arith.constant 0 : index
    %c0_12 = arith.constant 0 : index
    %11 = vector.load %arg5[%c0_11, %c0_12] : memref<1x128xf32, #tpu.memory_space<vmem>>, vector<1x128xf32>
    %12 = vector.broadcast %11 : vector<1x128xf32> to vector<16x128xf32>
    %13 = arith.addf %10, %12 : vector<16x128xf32>
    %cst_13 = arith.constant 0.000000e+00 : f32
    %14 = vector.broadcast %cst_13 : f32 to vector<16x128xf32>
    %15 = arith.maximumf %13, %14 : vector<16x128xf32>
    %16 = arith.truncf %15 : vector<16x128xf32> to vector<16x128xbf16>
    %c0_14 = arith.constant 0 : index
    %c0_15 = arith.constant 0 : index
    %17 = vector.load %arg6[%c0_14, %c0_15] : memref<128x16xbf16, #tpu.memory_space<vmem>>, vector<128x16xbf16>
    %cst_16 = arith.constant dense<0.000000e+00> : vector<16x16xf32>
    %18 = tpu.matmul %16, %17, %cst_16 {dimension_numbers = #tpu.dot_dimension_numbers<[1], [0], [0], [1], [0, 0, 1, 1], [], []>} : vector<16x128xbf16>, vector<128x16xbf16>, vector<16x16xf32> -> vector<16x16xf32>
    %19 = vector.extract_strided_slice %18 {offsets = [0, 0], sizes = [16, 8], strides = [1, 1]} : vector<16x16xf32> to vector<16x8xf32>
    %20 = vector.extract_strided_slice %18 {offsets = [0, 8], sizes = [16, 8], strides = [1, 1]} : vector<16x16xf32> to vector<16x8xf32>
    %21 = arith.truncf %19 : vector<16x8xf32> to vector<16x8xbf16>
    %cst_17 = arith.constant dense<0.000000e+00> : vector<16x8xf32>
    %22 = tpu.matmul %1, %21, %cst_17 {dimension_numbers = #tpu.dot_dimension_numbers<[1], [0], [0], [1], [0, 0, 1, 1], [], []>} : vector<16x16xbf16>, vector<16x8xbf16>, vector<16x8xf32> -> vector<16x8xf32>
    %23 = arith.addf %22, %20 : vector<16x8xf32>
    %c0_18 = arith.constant 0 : index
    %c0_19 = arith.constant 0 : index
    %24 = vector.load %arg7[%c0_18, %c0_19] : memref<1x8xf32, #tpu.memory_space<vmem>>, vector<1x8xf32>
    %25 = vector.broadcast %24 : vector<1x8xf32> to vector<16x8xf32>
    %26 = arith.addf %23, %25 : vector<16x8xf32>
    %27 = arith.negf %26 : vector<16x8xf32>
    %28 = math.exp %27 : vector<16x8xf32>
    %cst_20 = arith.constant 1.000000e+00 : f32
    %29 = vector.broadcast %cst_20 : f32 to vector<16x8xf32>
    %30 = arith.addf %29, %28 : vector<16x8xf32>
    %31 = arith.divf %29, %30 : vector<16x8xf32>
    %c0_21 = arith.constant 0 : index
    %c0_22 = arith.constant 0 : index
    %c0_23 = arith.constant 0 : index
    %32 = vector.load %arg8[%c0_21, %c0_22, %c0_23] : memref<1x16x8xf32, #tpu.memory_space<vmem>>, vector<1x16x8xf32>
    %33 = vector.shape_cast %32 : vector<1x16x8xf32> to vector<16x8xf32>
    %34 = vector.shape_cast %31 : vector<16x8xf32> to vector<1x16x8xf32>
    tpu.vector_store %arg8[%c0_21, %c0_22, %c0_23], %34 {strides = array<i32>} : memref<1x16x8xf32, #tpu.memory_space<vmem>>, vector<1x16x8xf32>,
    return
  }
  func.func @transform_0(%arg0: i32) -> (i32, i32, i32) {
    %c0_i32 = arith.constant 0 : i32
    %c0_i32_0 = arith.constant 0 : i32
    %c0_i32_1 = arith.constant 0 : i32
    return %arg0, %c0_i32, %c0_i32_0 : i32, i32, i32
  }
  func.func @transform_1(%arg0: i32) -> (i32, i32, i32) {
    %c0_i32 = arith.constant 0 : i32
    %c0_i32_0 = arith.constant 0 : i32
    %c0_i32_1 = arith.constant 0 : i32
    return %arg0, %c0_i32, %c0_i32_0 : i32, i32, i32
  }
  func.func @transform_2(%arg0: i32) -> (i32, i32) {
    %c0_i32 = arith.constant 0 : i32
    %c0_i32_0 = arith.constant 0 : i32
    %c0_i32_1 = arith.constant 0 : i32
    return %c0_i32, %c0_i32_0 : i32, i32
  }
  func.func @transform_3(%arg0: i32) -> (i32, i32) {
    %c0_i32 = arith.constant 0 : i32
    %c0_i32_0 = arith.constant 0 : i32
    %c0_i32_1 = arith.constant 0 : i32
    return %c0_i32, %c0_i32_0 : i32, i32
  }
  func.func @transform_4(%arg0: i32) -> (i32, i32) {
    %c0_i32 = arith.constant 0 : i32
    %c0_i32_0 = arith.constant 0 : i32
    %c0_i32_1 = arith.constant 0 : i32
    return %c0_i32, %c0_i32_0 : i32, i32
  }
  func.func @transform_5(%arg0: i32) -> (i32, i32) {
    %c0_i32 = arith.constant 0 : i32
    %c0_i32_0 = arith.constant 0 : i32
    %c0_i32_1 = arith.constant 0 : i32
    return %c0_i32, %c0_i32_0 : i32, i32
  }
  func.func @transform_6(%arg0: i32) -> (i32, i32) {
    %c0_i32 = arith.constant 0 : i32
    %c0_i32_0 = arith.constant 0 : i32
    %c0_i32_1 = arith.constant 0 : i32
    return %c0_i32, %c0_i32_0 : i32, i32
  }
  func.func @transform_7(%arg0: i32) -> (i32, i32, i32) {
    %c0_i32 = arith.constant 0 : i32
    %c0_i32_0 = arith.constant 0 : i32
    %c0_i32_1 = arith.constant 0 : i32
    return %arg0, %c0_i32, %c0_i32_0 : i32, i32, i32
  }
}

</mosaic_0001>

<bundles_post_ra>
// kernel: tpu_custom_call.1
= control target key start
LH: loop header
LB: loop body
LE: loop exit
PB: predicated region body
PF: predicated region fallthrough
CT: control target
= control target key end

     0   :  { %s1844_s0 = inlined_call_operand.hbm [shape: bf16[4,16,16], index: 0, kind: input, shape index: {}]   ;;  %s1845_s1 = inlined_call_operand.hbm [shape: bf16[4,16,8], index: 1, kind: input, shape index: {}]   ;;  %s1846_s2 = inlined_call_operand.hbm [shape: bf16[8,128], index: 2, kind: input, shape index: {}]   ;;  %s1847_s3 = inlined_call_operand.hbm [shape: bf16[8,128], index: 3, kind: input, shape index: {}]   ;;  %s1848_s4 = inlined_call_operand.hbm [shape: f32[1,128], index: 4, kind: input, shape index: {}]   ;;  %s1849_s5 = inlined_call_operand.hbm [shape: bf16[128,16], index: 5, kind: input, shape index: {}]   ;;  %s1850_s6 = inlined_call_operand.hbm [shape: f32[1,8], index: 6, kind: input, shape index: {}]   ;;  %s1851_s7 = inlined_call_operand.hbm [shape: f32[4,16,8], index: 7, kind: output, shape index: {}]  }
   0x1   :  { %1859 = sst [smem:[#allocation21_spill]] %s1844_s0 }
   0x2   :  { %1860 = sst [smem:[#allocation22_spill]] %s1846_s2 }
   0x3   :  { %1861 = sst [smem:[#allocation23_spill]] %s1847_s3 }
   0x4   :  { %1862 = sst [smem:[#allocation24_spill]] %s1848_s4 }
   0x5   :  { %1863 = sst [smem:[#allocation25_spill]] %s1849_s5 }
   0x6   :  { %1864 = sst [smem:[#allocation26_spill]] %s1850_s6 }
   0x7   :  { %12 = vsyncpa [#allocation3], 0 }
   0x8   :  { %14 = vsyncpa [#allocation3 + $0x1], 0 }
   0x9   :  { %15 = vsyncpa [#allocation6], 0 }
   0xa   :  { %17 = vsyncpa [#allocation6 + $0x1], 0 }
   0xb   :  { %18 = vsyncpa [#allocation9], 0 }
   0xc   :  { %19 = vsyncpa [#allocation12], 0 }
   0xd   :  { %20 = vsyncpa [#allocation4], 0 }
   0xe   :  { %22 = vsyncpa [#allocation4 + $0x1], 0  ;;  %s1484_s24 = smov 0   ;;  %s1486_s25 = smov 0  }
   0xf   :  { %s1488_s26 = smov 0   ;;  %s1490_s27 = smov 0  }
  0x10 LB: > { %s1429_s28 = smov [#allocation7]   ;;  %s1505_s30 = sadd.s32 4294967295, %s1427_s27   ;;  %s1427_s27 = sphi %s1490_s27, %s1893_s27   ;;  %s1423_s26 = sphi %s1488_s26, %s1892_s26   ;;  %s1419_s25 = sphi %s1486_s25, %s1891_s25   ;;  %s1415_s24 = sphi %s1484_s24, %s1890_s24  }
  0x11   : > { %s229_s29 = sshll.u32 %s1429_s28, 4  ;;  %p909_p0 = scmp.ge.s32.totalorder %s1427_s27, 1  ;;  %s230_s29 = int_to_ptr.vmem [resolvable:$true] %s229_s29 }
  0x12   : > { %p1852_p1 = scmp.eq.s32.totalorder %s1505_s30, 0  ;;  %p216_p2 = scmp.lt.s32.totalorder %s1427_s27, 5 }
  0x13   : > { %s1430_s9 = smov [#allocation8]   ;;  %s1431_s11 = smov [#allocation11]  }
  0x14   : > { %p1510_p3 = pnand %p909_p0, %p216_p2  ;;  %s240_s10 = sshll.u32 %s1430_s9, 4  ;;  %s1516_s10 = int_to_ptr.vmem [resolvable:$true] %s240_s10 }
  0x15   : > { %s261_s12 = sshll.u32 %s1431_s11, 4  ;;  %s1867_s2 = sld [smem:[#allocation22_spill]]  ;;  %s1524_s12 = int_to_ptr.vmem [resolvable:$true] %s261_s12 }
  0x16   : > { %s1865_s8 = scalar_select %p1510_p3, 1, 0 }
  0x17   : > { %p1044_p4 = pneg %p1510_p3 }
  0x19   : > { %p1520_p5 = pnand %p1044_p4, %p1852_p1 }
  0x1b   : > { %s1145_s16 = scalar_lea.hbm %s1867_s2, 64  ;;  %p1534_p7 = pneg %p1520_p5 }
  0x1c   : > { %p1146_p6 = scmp.ne.s32.totalorder %s1867_s2, %s1145_s16  ;;  %p1152_p10 = scmp.lt.u32.totalorder %s1145_s16, %s1867_s2 }
  0x1e   : > { %p1148_p8 = pnand %p1534_p7, %p1146_p6 }
  0x20   : > { %p1149_p9 = pneg %p1148_p8 }
  0x22   : > { %p1154_p11 = pnand %p1152_p10, %p1149_p9 }
  0x24   : > { %1157 = shalt.err (!%p1154_p11)
}
  0x25   : > { %s1158_s22 = scalar_lea.vmem %s230_s29, 64  ;;  %p1166_p2 = scmp.lt.s32.totalorder %s230_s29, %s230_s29 }
  0x26   : > { %p1159_p12 = scmp.ne.s32.totalorder %s230_s29, %s1158_s22  ;;  %p1167_p4 = scmp.lt.s32.totalorder %s1158_s22, %s1158_s22 }
  0x28   : > { %p1161_p13 = pnand %p1159_p12, %p1534_p7  ;;  %p1168_p1 = por %p1167_p4, %p1166_p2 }
  0x2a   : > { %p1162_p0 = pneg %p1161_p13 }
  0x2c   : > { %p1169_p3 = pnand %p1168_p1, %p1162_p0 }
  0x2e   : > { %1172 = shalt.err (!%p1169_p3)
}
  0x2f   : > { %1047 = dma.hbm_to_vmem [thread:$0]  (!%p1520_p5), %s1867_s2, 64, %s230_s29, [#allocation6]  }
  0x30   : > { %s1869_s3 = sld [smem:[#allocation23_spill]] }
  0x36   : > { %s1173_s14 = scalar_lea.hbm %s1869_s3, 64 }
  0x37   : > { %p1174_p6 = scmp.ne.s32.totalorder %s1869_s3, %s1173_s14  ;;  %p1180_p1 = scmp.lt.u32.totalorder %s1173_s14, %s1869_s3 }
  0x39   : > { %p1176_p8 = pnand %p1174_p6, %p1534_p7 }
  0x3b   : > { %p1177_p9 = pneg %p1176_p8 }
  0x3d   : > { %p1182_p3 = pnand %p1180_p1, %p1177_p9 }
  0x3f   : > { %1185 = shalt.err (!%p1182_p3)
}
  0x40   : > { %s1186_s29 = scalar_lea.vmem %s1516_s10, 64  ;;  %p1194_p13 = scmp.lt.s32.totalorder %s1516_s10, %s1516_s10 }
  0x41   : > { %p1187_p10 = scmp.ne.s32.totalorder %s1516_s10, %s1186_s29  ;;  %p1195_p0 = scmp.lt.s32.totalorder %s1186_s29, %s1186_s29 }
  0x43   : > { %p1189_p11 = pnand %p1187_p10, %p1534_p7  ;;  %p1196_p2 = por %p1195_p0, %p1194_p13 }
  0x45   : > { %p1190_p12 = pneg %p1189_p11 }
  0x47   : > { %p1197_p4 = pnand %p1196_p2, %p1190_p12 }
  0x49   : > { %1200 = shalt.err (!%p1197_p4)
}
  0x4a   : > { %1050 = dma.hbm_to_vmem [thread:$0]  (!%p1520_p5), %s1869_s3, 64, %s1516_s10, [#allocation9]  }
  0x4b   : > { %s1870_s5 = sld [smem:[#allocation25_spill]] }
  0x51   : > { %s1201_s28 = scalar_lea.hbm %s1870_s5, 1024 }
  0x52   : > { %p1202_p6 = scmp.ne.s32.totalorder %s1870_s5, %s1201_s28  ;;  %p1208_p1 = scmp.lt.u32.totalorder %s1201_s28, %s1870_s5 }
  0x54   : > { %p1204_p8 = pnand %p1202_p6, %p1534_p7 }
  0x56   : > { %p1205_p9 = pneg %p1204_p8 }
  0x58   : > { %p1210_p3 = pnand %p1208_p1, %p1205_p9 }
  0x5a   : > { %1213 = shalt.err (!%p1210_p3)
}
  0x5b   : > { %s1214_s10 = scalar_lea.vmem %s1524_s12, 1024  ;;  %p1222_p13 = scmp.lt.s32.totalorder %s1524_s12, %s1524_s12 }
  0x5c   : > { %p1215_p10 = scmp.ne.s32.totalorder %s1524_s12, %s1214_s10  ;;  %p1223_p0 = scmp.lt.s32.totalorder %s1214_s10, %s1214_s10 }
  0x5e   : > { %p1217_p11 = pnand %p1215_p10, %p1534_p7  ;;  %p1224_p2 = por %p1223_p0, %p1222_p13 }
  0x60   : > { %p1218_p12 = pneg %p1217_p11 }
  0x62   : > { %p1225_p4 = pnand %p1224_p2, %p1218_p12 }
  0x64   : > { %1228 = shalt.err (!%p1225_p4)
}
  0x65   : > { %s1854_s16 = smov 64   ;;  %s1856_s17 = smov 4  }
  0x66   : > { %1056 = dma.hbm_to_vmem [thread:$0]  (!%p1520_p5), %s1870_s5, 1024, %s1524_s12, [#allocation12], %s1854_s16, %s1854_s16, %s1856_s17  }
  0x67   : > { %s1434_s20 = smov [#allocation10]   ;;  %s1435_s22 = smov [#allocation13]  }
  0x68   : > { %s251_s21 = sshll.u32 %s1434_s20, 4  ;;  %s275_s23 = sshll.u32 %s1435_s22, 4  ;;  %s252_s21 = int_to_ptr.vmem [resolvable:$true] %s251_s21  ;;  %s276_s23 = int_to_ptr.vmem [resolvable:$true] %s275_s23 }
  0x69   : > { %s1871_s4 = sld [smem:[#allocation24_spill]] }
  0x6f   : > { %s1229_s11 = scalar_lea.hbm %s1871_s4, 16 }
  0x70   : > { %p1230_p6 = scmp.ne.s32.totalorder %s1871_s4, %s1229_s11  ;;  %p1236_p1 = scmp.lt.u32.totalorder %s1229_s11, %s1871_s4 }
  0x72   : > { %p1232_p8 = pnand %p1230_p6, %p1534_p7 }
  0x74   : > { %p1233_p9 = pneg %p1232_p8 }
  0x76   : > { %p1238_p3 = pnand %p1236_p1, %p1233_p9 }
  0x78   : > { %1241 = shalt.err (!%p1238_p3)
}
  0x79   : > { %s1242_s12 = scalar_lea.vmem %s252_s21, 16  ;;  %s1249_s18 = scalar_lea.vmem %s252_s21, 32 }
  0x7a   : > { %p1243_p10 = scmp.ne.s32.totalorder %s252_s21, %s1242_s12  ;;  %p1250_p13 = scmp.lt.s32.totalorder %s252_s21, %s252_s21 }
  0x7b   : > { %p1251_p0 = scmp.lt.s32.totalorder %s1249_s18, %s1242_s12 }
  0x7c   : > { %p1245_p11 = pnand %p1243_p10, %p1534_p7 }
  0x7d   : > { %p1252_p2 = por %p1251_p0, %p1250_p13 }
  0x7e   : > { %p1246_p12 = pneg %p1245_p11 }
  0x80   : > { %p1253_p4 = pnand %p1252_p2, %p1246_p12 }
  0x82   : > { %1256 = shalt.err (!%p1253_p4)
}
  0x83   : > { %1053 = dma.hbm_to_vmem [thread:$0]  (!%p1520_p5), %s1871_s4, 16, %s252_s21, [#allocation9]  }
  0x84   : > { %s1872_s6 = sld [smem:[#allocation26_spill]] }
  0x8a   : > { %s1257_s28 = scalar_lea.hbm %s1872_s6, 16 }
  0x8b   : > { %p1258_p6 = scmp.ne.s32.totalorder %s1872_s6, %s1257_s28  ;;  %p1264_p1 = scmp.lt.u32.totalorder %s1257_s28, %s1872_s6 }
  0x8d   : > { %p1260_p8 = pnand %p1258_p6, %p1534_p7 }
  0x8f   : > { %p1261_p9 = pneg %p1260_p8 }
  0x91   : > { %p1266_p3 = pnand %p1264_p1, %p1261_p9 }
  0x93   : > { %1269 = shalt.err (!%p1266_p3)
}
  0x94   : > { %s1270_s10 = scalar_lea.vmem %s276_s23, 16  ;;  %s1277_s21 = scalar_lea.vmem %s276_s23, 32 }
  0x95   : > { %p1271_p10 = scmp.ne.s32.totalorder %s276_s23, %s1270_s10  ;;  %p1278_p13 = scmp.lt.s32.totalorder %s276_s23, %s276_s23 }
  0x96   : > { %p1279_p0 = scmp.lt.s32.totalorder %s1277_s21, %s1270_s10 }
  0x97   : > { %p1273_p11 = pnand %p1271_p10, %p1534_p7 }
  0x98   : > { %p1280_p2 = por %p1279_p0, %p1278_p13 }
  0x99   : > { %p1274_p12 = pneg %p1273_p11 }
  0x9b   : > { %p1281_p4 = pnand %p1280_p2, %p1274_p12 }
  0x9d   : > { %1284 = shalt.err (!%p1281_p4)
}
  0x9e   : > { %1059 = dma.hbm_to_vmem [thread:$0]  (!%p1520_p5), %s1872_s6, 16, %s276_s23, [#allocation12]  }
  0x9f   : > { %s908_s19 = sadd.s32 4294967294, %s1427_s27   ;;  %s1637_s13 = sadd.s32 1, %s1427_s27  }
  0xa0   : > { %s35_s29 = sadd.s32 1, %s1423_s26  ;;  %s32_s20 = ssub.s32 %s1427_s27, %s1637_s13 }
  0xa1   : > { %p42_p7 = scmp.ne.s32.totalorder %s1423_s26, %s1419_s25  ;;  %p33_p6 = scmp.eq.s32.totalorder %s32_s20, 0 }
  0xa2   : > { %p43_p8 = scmp.eq.s32.totalorder %s1427_s27, 0  ;;  %p48_p9 = scmp.ne.s32.totalorder %s1419_s25, %s1415_s24 }
  0xa3   : > { %p203_p1 = scmp.eq.s32.totalorder %s1505_s30, 3  ;;  %p1873_p10 = scmp.eq.s32.totalorder %s1505_s30, 0 }
  0xa4   : > { %s1649_s2 = scalar_select %p33_p6, %s1423_s26, %s35_s29  }
  0xa5   : > { %p44_p3 = por %p43_p8, %p42_p7  ;;  %p1653_p11 = por %p1873_p10, %p48_p9 }
  0xa6   : > { %p1657_p5 = por %p203_p1, %p42_p7  ;;  %p209_p12 = scmp.eq.s32.totalorder %s908_s19, 3 }
  0xa7   : > { %p1076_p13 = scmp.lt.s32.totalorder %s1427_s27, 4  ;;  %s286_s28 = sand.u32 1, %s1423_s26  }
  0xa8   : > { %s1875_s23 = scalar_select %p1657_p5, 1, 0 }
  0xa9   : > { %p1663_p0 = por %p209_p12, %p48_p9  ;;  %s1667_s11 = sshll.u32 %s286_s28, 3 }
  0xaa   : > { %s954_s14 = sshll.u32 %s1427_s27, 7  ;;  %s1877_s0 = sld [smem:[#allocation21_spill]] }
  0xab   : > { %s1876_s9 = scalar_select %p1663_p0, 1, 0 }
  0xac   : > { %s290_s12 = scalar_lea.vmem [#allocation2], %s1667_s11  ;;  %p1676_p2 = pnand %p1076_p13, %p44_p3 }
  0xad   : > { %s297_s18 = sshll.u32 %s290_s12, 4  ;;  %s1685_s15 = scalar_lea.hbm %s1845_s1, %s954_s14  ;;  %s1680_s18 = int_to_ptr.vmem [resolvable:$true] %s297_s18 }
  0xae   : > { %s1687_s10 = scalar_lea.sflag [#allocation3], %s286_s28  ;;  %p1287_p7 = pneg %p1676_p2 }
  0xb0   : > { %s1673_s21 = scalar_lea.hbm %s1877_s0, %s954_s14  ;;  %s1290_s3 = scalar_lea.hbm %s1877_s0, 512 }
  0xb1   : > { %s1285_s16 = scalar_lea.hbm %s1673_s21, 128  ;;  %p1291_p9 = scmp.lt.u32.totalorder %s1673_s21, %s1877_s0 }
  0xb2   : > { %p1286_p4 = scmp.ne.s32.totalorder %s1673_s21, %s1285_s16  ;;  %p1292_p1 = scmp.lt.u32.totalorder %s1290_s3, %s1285_s16 }
  0xb3   : > { %p1294_p10 = scmp.lt.u32.totalorder %s1285_s16, %s1673_s21 }
  0xb4   : > { %p1288_p6 = pnand %p1287_p7, %p1286_p4  ;;  %p1293_p3 = por %p1292_p1, %p1291_p9 }
  0xb6   : > { %p1289_p8 = pneg %p1288_p6  ;;  %p1295_p12 = por %p1294_p10, %p1293_p3 }
  0xb8   : > { %p1296_p13 = pnand %p1295_p12, %p1289_p8 }
  0xba   : > { %1299 = shalt.err (!%p1296_p13)
}
  0xbb   : > { %s1300_s28 = scalar_lea.vmem %s1680_s18, 128  ;;  %s1436_s17 = smov [#allocation2]  }
  0xbc   : > { %p1301_p4 = scmp.ne.s32.totalorder %s1680_s18, %s1300_s28  ;;  %s1305_s14 = sshll.u32 %s1436_s17, 4  ;;  %s1306_s14 = int_to_ptr.vmem [resolvable:$false] %s1305_s14 }
  0xbd   : > { %s1307_s4 = scalar_lea.vmem %s1306_s14, 256  ;;  %p1308_p5 = scmp.lt.s32.totalorder %s1680_s18, %s1306_s14 }
  0xbe   : > { %p1303_p6 = pnand %p1301_p4, %p1287_p7  ;;  %p1309_p9 = scmp.lt.s32.totalorder %s1307_s4, %s1300_s28 }
  0xc0   : > { %p1304_p0 = pneg %p1303_p6  ;;  %p1310_p1 = por %p1309_p9, %p1308_p5 }
  0xc2   : > { %p1311_p3 = pnand %p1310_p1, %p1304_p0 }
  0xc4   : > { %1314 = shalt.err (!%p1311_p3)
}
  0xc5   : > { %s1879_s3 = smov 4   ;;  %s1880_s5 = smov 64  }
  0xc6   : > { %1063 = dma.hbm_to_vmem [thread:$0]  (!%p1676_p2), %s1673_s21, 128, %s1680_s18, %s1687_s10, %s1880_s5, %s1880_s5, %s1879_s3  }
  0xc7   : > { %s311_s16 = scalar_lea.vmem [#allocation5], %s1667_s11  ;;  %s307_s20 = sand.u32 1, %s1427_s27  }
  0xc8   : > { %s318_s29 = sshll.u32 %s311_s16, 4  ;;  %s1722_s12 = scalar_lea.sflag [#allocation6], %s307_s20  ;;  %s1720_s29 = int_to_ptr.vmem [resolvable:$true] %s318_s29 }
  0xc9   : > { %s1315_s28 = scalar_lea.hbm %s1685_s15, 128  ;;  %s1320_s4 = scalar_lea.hbm %s1845_s1, 512 }
  0xca   : > { %p1316_p5 = scmp.ne.s32.totalorder %s1685_s15, %s1315_s28  ;;  %p1321_p10 = scmp.lt.u32.totalorder %s1685_s15, %s1845_s1 }
  0xcb   : > { %p1322_p12 = scmp.lt.u32.totalorder %s1320_s4, %s1315_s28  ;;  %p1324_p4 = scmp.lt.u32.totalorder %s1315_s28, %s1685_s15 }
  0xcc   : > { %p1318_p0 = pnand %p1316_p5, %p1287_p7 }
  0xcd   : > { %p1323_p13 = por %p1322_p12, %p1321_p10 }
  0xce   : > { %p1319_p8 = pneg %p1318_p0 }
  0xcf   : > { %p1325_p6 = por %p1324_p4, %p1323_p13 }
  0xd1   : > { %p1326_p9 = pnand %p1325_p6, %p1319_p8 }
  0xd3   : > { %1329 = shalt.err (!%p1326_p9)
}
  0xd4   : > { %s1330_s11 = scalar_lea.vmem %s1720_s29, 128  ;;  %s1437_s21 = smov [#allocation5]  }
  0xd5   : > { %p1331_p1 = scmp.ne.s32.totalorder %s1720_s29, %s1330_s11  ;;  %s1335_s18 = sshll.u32 %s1437_s21, 4  ;;  %s1336_s18 = int_to_ptr.vmem [resolvable:$false] %s1335_s18 }
  0xd6   : > { %s1337_s0 = scalar_lea.vmem %s1336_s18, 256  ;;  %p1338_p0 = scmp.lt.s32.totalorder %s1720_s29, %s1336_s18 }
  0xd7   : > { %p1333_p3 = pnand %p1331_p1, %p1287_p7  ;;  %p1339_p10 = scmp.lt.s32.totalorder %s1337_s0, %s1330_s11 }
  0xd9   : > { %p1334_p5 = pneg %p1333_p3  ;;  %p1340_p12 = por %p1339_p10, %p1338_p0 }
  0xdb   : > { %p1341_p13 = pnand %p1340_p12, %p1334_p5 }
  0xdd   : > { %1344 = shalt.err (!%p1341_p13)
}
  0xde   : > { %1066 = dma.hbm_to_vmem [thread:$0]  (!%p1676_p2), %s1685_s15, 128, %s1720_s29, %s1722_s12, %s1880_s5, %s1880_s5, %s1879_s3  }
  0xdf   : > { %p1881_p7 = scmp.ne.s32.totalorder %s1865_s8, 0 }
  0xe0   : > { %s1754_s6 = sand.u32 (!%p1881_p7), 1, %s1419_s25  }
  0xe1   : > { %330 = sbr.rel (%p1881_p7) target bundleno = 1167 (0x48f), region = 48  ;;  %s923_s10 = sshll.u32 (!%p1881_p7), %s1754_s6, 3 }
  0xe2   : > { %s333_s16 = scalar_lea.sflag (!%p1881_p7), [#allocation3], %s1754_s6  ;;  %s336_s20 = scalar_lea.vmem (!%p1881_p7), [#allocation2], %s923_s10 }
  0xe8   : > { %1390 = dma.done.wait (%p1653_p11), %s333_s16, 128  }
  0xe9   : > { %1392 = vsyncadd (%p1653_p11), %s333_s16, 4294967168  ;;  %s341_s19 = sand.u32 1, %s1505_s30   ;;  %s345_s8 = scalar_lea.vmem [#allocation5], %s923_s10 }
  0xea   : > { %s342_s15 = scalar_lea.sflag [#allocation6], %s341_s19 }
  0xeb   : > { %1394 = dma.done.wait (%p1653_p11), %s342_s15, 128  }
  0xec   : > { %1396 = vsyncadd (%p1653_p11), %s342_s15, 4294967168  ;;  %p1882_p2 = scmp.eq.s32.totalorder %s1505_s30, 0 }
  0xee   : > { %1398 = dma.done.wait (%p1882_p2), [#allocation6], 64   ;;  %p1883_p8 = pmov %p1882_p2 }
  0xef   : > { %p1884_p4 = pmov %p1882_p2 }
  0xf0   : > { %1400 = vsyncadd (%p1883_p8), [#allocation6], 4294967232 }
  0xf1   : > { %1402 = dma.done.wait (%p1884_p4), [#allocation9], 80   ;;  %p1885_p6 = pmov %p1882_p2 }
  0xf2   : > { %p1886_p9 = pmov %p1882_p2 }
  0xf3   : > { %1404 = vsyncadd (%p1885_p6), [#allocation9], 4294967216 }
  0xf4   : > { %1406 = dma.done.wait (%p1886_p9), [#allocation12], 1040   ;;  %p1887_p1 = pmov %p1882_p2 }
  0xf5   : > { %v1438_v0 = vmov 0.0   ;;  %vm1439_vm0 = vmmov 0   ;;  %v1127_v1 = vld [vmem:[%s345_s8] sm:$0xff]   ;;  %vm469_vm1 = vcmask 1043456   ;;  %v1781_v2 = vld [vmem:[%s336_s20] sm:$0xff]   ;;  %vm417_vm2 = vcmask 130048  }
  0xf6   : > { %1408 = vsyncadd (%p1887_p1), [#allocation12], 4294966256  ;;  %974 = vmatprep.subr.bf16.mxu0 %v1438_v0  ;;  %976 = vmatprep.mubr.msk.bf16.mxu0 %vm1439_vm0, %v1438_v0  ;;  %v464_v3 = vld [vmem:[#allocation8] sm:$0xf]  ;;  %vm465_vm3 = vcmask 64512   ;;  %v1129_v7 = vld [vmem:[#allocation11] sm:$0xff]  }
  0xf7   : > { %992 = vmatprep.subr.bf16.mxu1 %v1438_v0  ;;  %1008 = vmatprep.mubr.msk.bf16.mxu1 %vm1439_vm0, %v1438_v0  ;;  %v471_v4 = vsel %vm469_vm1, %v464_v3, 0  ;;  %v463_v5 = vld [vmem:[#allocation7] sm:$0xf]  ;;  %v1130_v8 = vld [vmem:[#allocation11 + $0x8] sm:$0xff]   ;;  %v1133_v11 = vld [vmem:[#allocation11 + $0x20] sm:$0xff]   ;;  %s1440_s22 = smov 120  }
  0xf8   : > { %975 = vmatpush3.bf16.msra.mxu0 %v1127_v1  ;;  %v518_v6 = vsel %vm469_vm1, %v463_v5, 0  ;;  %993 = vmatpush3.bf16.msra.mxu1 %v1129_v7  ;;  %v1131_v9 = vld [vmem:[#allocation11 + $0x10] sm:$0xff]   ;;  %v1132_v10 = vld [vmem:[#allocation11 + $0x18] sm:$0xff]   ;;  %v1134_v21 = vld [vmem:[#allocation11 + $0x28] sm:$0xff]   ;;  %s930_s3 = sshll.u32 %s1754_s6, 4  ;;  %s956_s5 = sshll.u32 %s1505_s30, 8 }
  0xf9   : > { %980 = vmatprep.subr.bf16.mxu0 %v1438_v0  ;;  %994 = vmatprep.subr.bf16.mxu1 %v1438_v0  ;;  %v1135_v22 = vld [vmem:[#allocation11 + $0x30] sm:$0xff]   ;;  %v1136_v23 = vld [vmem:[#allocation11 + $0x38] sm:$0xff]   ;;  %v946_v43 = vld [vmem:[#allocation13] ss:$0 sm:$0xff]  ;;  %s400_s29 = scalar_lea.vmem [#allocation14], %s930_s3  ;;  %s1797_s14 = scalar_lea.hbm %s1851_s7, %s956_s5 }
  0xfa   : > { %v936_v25 = vld [vmem:[#allocation10] ss:$0 sm:$0xff]  ;;  %s765_s12 = sshll.u32 %s400_s29, 4  ;;  %s752_s4 = scalar_lea.sflag [#allocation4], %s1754_s6  ;;  %s1799_s12 = int_to_ptr.vmem [resolvable:$true] %s765_s12 }
  0xfb   : > { %977 = vmatmul.mubr.msk.bf16.vlgmr.msra.gmra.mrb[0].mxu0 %vm417_vm2, %v1781_v2  ;;  %s1345_s30 = scalar_lea.vmem %s1799_s12, 256  ;;  %p1888_p3 = scmp.ne.s32.totalorder %s1875_s23, 0 }
  0xfc   : > { %981 = vmatpush3.bf16.msra.mxu0 %v471_v4  ;;  %982 = vmatprep.mubr.msk.bf16.mxu0 %vm1439_vm0, %v1438_v0  ;;  %p1346_p11 = scmp.ne.s32.totalorder %s1799_s12, %s1345_s30  ;;  %s1441_s11 = smov [#allocation14]  }
  0xfd   : > { %986 = vmatprep.subr.bf16.mxu0 %v1438_v0  ;;  %995 = vmatpush3.bf16.msra.mxu1 %v1130_v8  ;;  %s1349_s21 = sshll.u32 %s1441_s11, 4  ;;  %s1350_s21 = int_to_ptr.vmem [resolvable:$false] %s1349_s21 }
  0xfe   : > { %996 = vmatprep.subr.bf16.mxu1 %v1438_v0  ;;  %p1347_p5 = pnand %p1346_p11, %p1888_p3  ;;  %s1351_s18 = scalar_lea.vmem %s1350_s21, 512 }
  0xff   : > { %p1352_p10 = scmp.lt.s32.totalorder %s1799_s12, %s1350_s21  ;;  %p1353_p12 = scmp.lt.s32.totalorder %s1351_s18, %s1345_s30 }
 0x100   : > { %p1348_p0 = pneg %p1347_p5 }
 0x101   : > { %997 = vmatpush3.bf16.msra.mxu1 %v1131_v9  ;;  %p1354_p13 = por %p1353_p12, %p1352_p10 }
 0x102   : > { %998 = vmatprep.subr.bf16.mxu1 %v1438_v0 }
 0x103   : > { %983 = vmatmul.mubr.msk.bf16.vlgmr.msra.gmra.mrb[4].mxu0 %vm465_vm3, %v1127_v1  ;;  %p1355_p7 = pnand %p1354_p13, %p1348_p0 }
 0x104   : > { %988 = vmatprep.mubr.msk.bf16.mxu0 %vm1439_vm0, %v1438_v0  ;;  %987 = vmatpush3.bf16.msra.mxu0 %v518_v6 }
 0x105   : > { %1012 = vmatprep.subr.bf16.mxu0 %v1438_v0  ;;  %999 = vmatpush3.bf16.msra.mxu1 %v1132_v10 }
 0x106   : > { %1000 = vmatprep.subr.bf16.mxu1 %v1438_v0 }
 0x109   : > { %1001 = vmatpush3.bf16.msra.mxu1 %v1133_v11 }
 0x10a   : > { %1002 = vmatprep.subr.bf16.mxu1 %v1438_v0 }
 0x10d   : > { %1003 = vmatpush3.bf16.msra.mxu1 %v1134_v21 }
 0x10e   : > { %1004 = vmatprep.subr.bf16.mxu1 %v1438_v0 }
 0x111   : > { %1005 = vmatpush3.bf16.msra.mxu1 %v1135_v22 }
 0x112   : > { %1006 = vmatprep.subr.bf16.mxu1 %v1438_v0 }
 0x115   : > { %1007 = vmatpush3.bf16.msra.mxu1 %v1136_v23 }
 0x1ce   : > { %v455_v12 = vpop.f32.mrb[0].mxu0 }
 0x1cf   : > { %v978_v13 = vpop.f32.mrb[1].mxu0 }
 0x1d0   : > { %v458_v14 = vpop.f32.mrb[2].mxu0 }
 0x1d1   : > { %v462_v15 = vpack.c.bf16 %v458_v14, %v455_v12  ;;  %v979_v16 = vpop.f32.mrb[3].mxu0 }
 0x1d3   : > { %989 = vmatmul.mubr.msk.bf16.vlgmr.msra.gmra.mrb[8].mxu0 %vm465_vm3, %v462_v15 }
 0x1d4   : > { %1014 = vmatprep.mubr.msk.bf16.mxu0 %vm1439_vm0, %v1438_v0 }
 0x1d6   : > { %v507_v17 = vpop.f32.mrb[4].mxu0 }
 0x1d7   : > { %v984_v18 = vpop.f32.mrb[5].mxu0 }
 0x1d8   : > { %v510_v19 = vpop.f32.mrb[6].mxu0 }
 0x1d9   : > { %v985_v20 = vpop.f32.mrb[7].mxu0 }
 0x2a6   : > { %v554_v24 = vpop.f32.mrb[8].mxu0 }
 0x2a7   : > { %v555_v26 = vadd.f32 %v554_v24, %v507_v17  ;;  %v990_v27 = vpop.f32.mrb[9].mxu0 }
 0x2a8   : > { %v557_v28 = vpop.f32.mrb[10].mxu0 }
 0x2a9   : > { %v568_v29 = vadd.f32 %v936_v25, %v555_v26  ;;  %v558_v30 = vadd.f32 %v557_v28, %v510_v19  ;;  %v991_v31 = vpop.f32.mrb[11].mxu0 }
 0x2ab   : > { %v569_v32 = vadd.f32 %v936_v25, %v558_v30  ;;  %v570_v33 = vmax.f32 %v568_v29, 0.0 }
 0x2ad   : > { %v571_v34 = vmax.f32 %v569_v32, 0.0 }
 0x2af   : > { %v572_v35 = vpack.c.bf16 %v571_v34, %v570_v33 }
 0x2b1   : > { %1009 = vmatmul.mubr.bf16.vlgmr.msra.gmra.mrb[0].mxu1 %v572_v35 }
 0x384   : > { %v671_v36 = vpop.f32.mrb[0].mxu1 }
 0x385   : > { %681 = vrot.lane.b32.xlu0 %v671_v36, %s1440_s22  ;;  %v1010_v37 = vpop.f32.mrb[1].mxu1 }
 0x386   : > { %v674_v38 = vpop.f32.mrb[2].mxu1 }
 0x387   : > { %v678_v39 = vpack.c.bf16 %v674_v38, %v671_v36  ;;  %v1011_v40 = vpop.f32.mrb[3].mxu1 }
 0x389   : > { %683 = vrot.lane.b32.xlu0 %v674_v38, %s1440_s22  ;;  %1013 = vmatpush3.bf16.msra.mxu0 %v678_v39 }
 0x38c   : > { %1015 = vmatmul.mubr.msk.bf16.vlgmr.msra.gmra.mrb[12].mxu0 %vm417_vm2, %v1781_v2 }
 0x3f7   : > { %v682_v41 = vpop.permute.xlu0 %681 }
 0x3fb   : > { %v684_v46 = vpop.permute.xlu0 %683 }
 0x45f   : > { %v721_v42 = vpop.f32.mrb[12].mxu0 }
 0x460   : > { %v722_v44 = vadd.f32 %v721_v42, %v682_v41  ;;  %v1016_v45 = vpop.f32.mrb[13].mxu0 }
 0x461   : > { %v724_v47 = vpop.f32.mrb[14].mxu0 }
 0x462   : > { %v735_v48 = vadd.f32 %v946_v43, %v722_v44  ;;  %v725_v49 = vadd.f32 %v724_v47, %v684_v46  ;;  %v1017_v50 = vpop.f32.mrb[15].mxu0 }
 0x464   : > { %v947_v51 = vmul.f32 -1.442695, %v735_v48  ;;  %v736_v52 = vadd.f32 %v946_v43, %v725_v49 }
 0x466   : > { %1137 = vpow2.f32 %v947_v51  ;;  %v948_v53 = vmul.f32 -1.442695, %v736_v52 }
 0x468   : > { %1139 = vpow2.f32 %v948_v53 }
 0x470   : > { %v1138_v54 = vpop.eup %1137 }
 0x471   : > { %v743_v55 = vadd.f32 1.0, %v1138_v54 }
 0x472   : > { %v1140_v56 = vpop.eup %1139 }
 0x473   : > { %1141 = vrcp.f32 %v743_v55  ;;  %v744_v57 = vadd.f32 1.0, %v1140_v56 }
 0x475   : > { %1143 = vrcp.f32 %v744_v57 }
 0x47d   : > { %v1142_v58 = vpop.eup %1141 }
 0x47e   : > { %749 = vst.msk [vmem:[%s400_s29] sm:$0xff] %vm465_vm3, %v1142_v58 }
 0x47f   : > { %v1144_v59 = vpop.eup %1143 }
 0x480   : > { %750 = vst.msk [vmem:[%s400_s29 + $0x8] sm:$0xff] %vm465_vm3, %v1144_v59 }
 0x481   : > { %1358 = shalt.err (!%p1355_p7)
}
 0x482   : > { %s1359_s0 = scalar_lea.hbm %s1797_s14, 256  ;;  %s1363_s20 = scalar_lea.hbm %s1851_s7, 1024 }
 0x483   : > { %p1360_p2 = scmp.ne.s32.totalorder %s1797_s14, %s1359_s0  ;;  %p1364_p6 = scmp.lt.u32.totalorder %s1797_s14, %s1851_s7 }
 0x484   : > { %p1365_p9 = scmp.lt.u32.totalorder %s1363_s20, %s1359_s0  ;;  %p1367_p11 = scmp.lt.u32.totalorder %s1359_s0, %s1797_s14 }
 0x485   : > { %p1361_p8 = pnand %p1360_p2, %p1888_p3 }
 0x486   : > { %p1366_p1 = por %p1365_p9, %p1364_p6 }
 0x487   : > { %p1362_p4 = pneg %p1361_p8 }
 0x488   : > { %p1368_p5 = por %p1367_p11, %p1366_p1 }
 0x48a   : > { %p1369_p0 = pnand %p1368_p5, %p1362_p4 }
 0x48c   : > { %1372 = shalt.err (!%p1369_p0)
}
 0x48d   : > { %s1442_s8 = smov 128   ;;  %s1443_s22 = smov 8  }
 0x48e   : > { %1042 = dma.vmem_to_hbm [thread:$0]  (%p1888_p3), %s1799_s12, 256, %s1797_s14, %s752_s4, %s1442_s8, %s1442_s8, %s1443_s22  }
 0x48f PF: > { %p1082_p10 = scmp.ge.s32.totalorder %s1427_s27, 2  ;;  %s780_s3 = sand.u32 1, %s1415_s24  }
 0x490   : > { %p1889_p12 = scmp.ne.s32.totalorder %s1876_s9, 0  ;;  %s781_s5 = scalar_lea.sflag [#allocation4], %s780_s3 }
 0x492   : > { %p1068_p13 = pnand %p1082_p10, %p1889_p12 }
 0x494   : > { %1410 = dma.done.wait (!%p1068_p13), %s781_s5, 256  }
 0x495   : > { %1412 = vsyncadd (!%p1068_p13), %s781_s5, 4294967040  ;;  %p25_p7 = scmp.ge.s32.totalorder %s1637_s13, 6   ;;  %s1890_s24 = smov %s1419_s25 }
 0x496   : > { %s1891_s25 = smov %s1423_s26  ;;  %s1892_s26 = smov %s1649_s2 }
 0x497   : > { %s1893_s27 = smov %s1637_s13  ;;  %27 = sbr.rel (!%p25_p7) target bundleno = 16 (0x10), region = 126 }
 0x49e   :  { %786 = vsyncpa [#allocation3], 1 }
 0x49f   :  { %788 = vsyncpa [#allocation3 + $0x1], 1 }
 0x4a0   :  { %789 = vsyncpa [#allocation6], 1 }
 0x4a1   :  { %791 = vsyncpa [#allocation6 + $0x1], 1 }
 0x4a2   :  { %792 = vsyncpa [#allocation9], 1 }
 0x4a3   :  { %793 = vsyncpa [#allocation12], 1 }
 0x4a4   :  { %794 = vsyncpa [#allocation4], 1 }
 0x4a5   :  { %796 = vsyncpa [#allocation4 + $0x1], 1 }

</bundles_post_ra>
